<compile_context>
chip_gen: v7x
topology: tpu7x:2x2x1
jax: 0.10.0
libtpu: 0.0.40
codegen_flags: <defaults>
</compile_context>

<pallas_src>
import jax
import jax.numpy as jnp
from jax.experimental import pallas as pl
from jax.experimental.pallas import tpu as pltpu

_LANE = 128
_SUBLANE = 8
_GRANULE = _SUBLANE * _LANE            # 1024 pixels: rounding unit for tiles

_VMEM_PIPE_BUDGET = 24 * 1024 * 1024   # 2 inputs x 2 pipeline buffers (v7x-safe)
_TARGET_STEP_BYTES = 7 * 1024 * 1024   # per-step input DMA target (hide ~0.35us step cost)


def _acos_f32(r):
    """float32 acos via the cephes asin polynomial (|rel err| ~ 1e-7).

    Uses only sqrt / mul / add / compare / select so it lowers on any TPU.
    Propagates NaN for NaN inputs and for |r| > 1 (sqrt of a negative),
    matching torch.acos semantics; exact at r == +-1.
    """
    big = r > 0.5
    small = r < -0.5
    # Reduced argument: always in [0, 0.5] for the big/small branches and in
    # [-0.5, 0.5] for the middle branch (the cephes polynomial domain).
    x = jnp.where(big, jnp.sqrt(0.5 * (1.0 - r)),
                  jnp.where(small, jnp.sqrt(0.5 * (1.0 + r)), r))
    z = x * x
    p = ((((4.2163199048e-2 * z + 2.4181311049e-2) * z + 4.5470025998e-2) * z
          + 7.4953002686e-2) * z + 1.6666752422e-1)
    asin_core = x + x * z * p          # asin(x) for |x| <= 0.5
    pio2 = 1.5707963267948966
    pi = 3.141592653589793
    return jnp.where(big, 2.0 * asin_core,
                     jnp.where(small, pi - 2.0 * asin_core, pio2 - asin_core))


def _sam_kernel(base_ref, pred_ref, out_ref):
    """One grid step == one (batch item, pixel tile) pair.

    base_ref / pred_ref : (1, C, t8, 128) VMEM tiles in their native dtype
    out_ref             : (1, 1, 8, 256) lane-dense block:
                          lanes [0:128)   partial sum of spectral angles (rad)
                          lanes [128:256) partial count of pixels with t > 0
    """
    C = base_ref.shape[1]
    t8 = base_ref.shape[2]

    sum1 = jnp.zeros((t8, _LANE), jnp.float32)
    sum2 = jnp.zeros((t8, _LANE), jnp.float32)
    sum3 = jnp.zeros((t8, _LANE), jnp.float32)
    # Static per-channel loop: keeps live f32 temporaries to a few (t8,128)
    # planes instead of full (C,t8,128) copies.  C is a Python int (static).
    for c in range(C):
        x = base_ref[0, c].astype(jnp.float32)
        y = pred_ref[0, c].astype(jnp.float32)
        sum1 = sum1 + x * y
        sum2 = sum2 + x * x
        sum3 = sum3 + y * y

    t = jnp.sqrt(sum2 * sum3)
    valid = (t > 0.0).astype(jnp.float32)

    # ratio = cos(angle); 0/0 -> NaN (matches torch), |r| > 1 -> NaN in acos.
    # Exact divide (not approx reciprocal) keeps the NaN/boundary behavior
    # faithful; the kernel is HBM-bound so this is hidden.
    r = sum1 / t
    angle = _acos_f32(r)
    # torch.where(isnan(angle), 0, angle) -- scalar 0.0, no full-tile broadcast
    angle = jnp.where(jnp.isnan(angle), 0.0, angle)

    # Sublane-group partial sums (layout-preserving reshape: (8,128) vreg
    # groups stay intact) -> one lane-dense (8, 256) store per step.
    g = t8 // _SUBLANE
    angle8 = jnp.sum(angle.reshape(g, _SUBLANE, _LANE), axis=0)
    count8 = jnp.sum(valid.reshape(g, _SUBLANE, _LANE), axis=0)
    out_ref[0, 0] = jnp.concatenate([angle8, count8], axis=-1)


def _choose_hw_tile(C, hw_pad, itemsize, B):
    """Pick an HW tile (pixels): multiple of 1024, divisor of hw_pad,
    ~7 MiB input DMA per step, pipeline buffers <= 24 MiB (v7x-safe),
    and at least 2 total grid steps so both v7x TensorCores get work."""
    granules = hw_pad // _GRANULE
    per_granule_step = 2 * C * _GRANULE * itemsize       # both inputs, one buffer
    budget_g = max(1, _VMEM_PIPE_BUDGET // (2 * per_granule_step))
    target_g = max(1, _TARGET_STEP_BYTES // per_granule_step)
    g = max(1, min(budget_g, target_g, granules))
    # Megacore load balance (v7x has 2 TCs): keep >= 2 grid steps if possible.
    if B * ((granules + g - 1) // g) < 2 and granules > 1:
        g = (granules + 1) // 2
    # The tile must evenly divide the granule-padded pixel count (no ragged
    # last block, no re-visited pixels).
    while granules % g:
        g -= 1
    return g * _GRANULE


def sam_loss(img_base, img_out, *, hw_tile=None):
    """Pallas implementation of SAMLoss.forward (scalar result, in degrees)."""
    if img_base.ndim == 5:
        img_base = img_base[:, 0]
    if img_out.ndim == 5:
        img_out = img_out[:, 0]

    B, C, H, W = img_base.shape
    HW = H * W
    itemsize = max(jnp.dtype(img_base.dtype).itemsize,
                   jnp.dtype(img_out.dtype).itemsize)

    # Pad only to the 1024-pixel granule (zero pixels have t == 0, so they add
    # nothing to the angle sum nor to the valid count: padding is free
    # semantically, and at most 1023 dead pixels are ever streamed).
    hw_pad = pl.cdiv(HW, _GRANULE) * _GRANULE
    if hw_tile is None:
        hw_tile = _choose_hw_tile(C, hw_pad, itemsize, B)
    assert hw_tile % _GRANULE == 0, "hw_tile must be a multiple of 1024"
    assert hw_pad % hw_tile == 0, "hw_tile must divide the granule-padded H*W"

    nt = hw_pad // hw_tile          # pixel tiles per batch item
    t8 = hw_tile // _LANE           # sublane rows per tile (multiple of 8)

    xb = img_base.reshape(B, C, HW)
    xo = img_out.reshape(B, C, HW)
    if hw_pad != HW:
        pad = ((0, 0), (0, 0), (0, hw_pad - HW))
        xb = jnp.pad(xb, pad)
        xo = jnp.pad(xo, pad)
    xb = xb.reshape(B, C, hw_pad // _LANE, _LANE)
    xo = xo.reshape(B, C, hw_pad // _LANE, _LANE)

    # Explicit VMEM limit: pipeline buffers + generous allowance for the
    # in-kernel f32 per-pixel planes; clamped to [32 MiB, 48 MiB] so it is
    # always accepted on v5e/v6e (128 MiB) and v7x (64 MiB physical).
    pipe_bytes = 2 * 2 * C * hw_tile * itemsize
    temp_bytes = 16 * hw_tile * 4
    vmem_limit = int(max(32 << 20, min(48 << 20,
                                       pipe_bytes + temp_bytes + (8 << 20))))

    part = pl.pallas_call(
        _sam_kernel,
        out_shape=jax.ShapeDtypeStruct((B, nt, _SUBLANE, 2 * _LANE),
                                       jnp.float32),
        grid_spec=pltpu.PrefetchScalarGridSpec(
            num_scalar_prefetch=0,
            grid=(B, nt),
            in_specs=[
                pl.BlockSpec((1, C, t8, _LANE), lambda b, t: (b, 0, t, 0)),
                pl.BlockSpec((1, C, t8, _LANE), lambda b, t: (b, 0, t, 0)),
            ],
            out_specs=pl.BlockSpec((1, 1, _SUBLANE, 2 * _LANE),
                                   lambda b, t: (b, t, 0, 0)),
        ),
        compiler_params=pltpu.CompilerParams(
            dimension_semantics=("parallel", "parallel"),
            vmem_limit_bytes=vmem_limit,
        ),
    )(xb, xo)

    # Tiny final reduction + scalar epilogue (branch on num == 0, degrees).
    sumangle = jnp.sum(part[..., :_LANE])
    num = jnp.sum(part[..., _LANE:])
    averangle = jnp.where(num == 0, sumangle, sumangle / num)
    return averangle * 180.0 / 3.14159256  # constant copied verbatim from module


def _sam_ref(img_base, img_out):
    """Pure-JAX reference mirroring the PyTorch module."""
    if img_base.ndim == 5:
        img_base = img_base[:, 0]
    if img_out.ndim == 5:
        img_out = img_out[:, 0]
    s1 = jnp.sum(img_base * img_out, 1)
    s2 = jnp.sum(img_base * img_base, 1)
    s3 = jnp.sum(img_out * img_out, 1)
    t = jnp.sqrt(s2 * s3)
    num = jnp.sum(t > 0)
    ang = jnp.arccos(s1 / t)
    sa = jnp.where(jnp.isnan(ang), jnp.zeros_like(ang), ang).sum()
    avg = jnp.where(num == 0, sa, sa / num)
    return avg * 180.0 / 3.14159256


if __name__ == "__main__":
    key = jax.random.PRNGKey(0)
    k1, k2 = jax.random.split(key)
    # NCHW inputs, small shapes: batch=2, channels=4, spatial=16x16
    img_base = jax.random.normal(k1, (2, 4, 16, 16), dtype=jnp.float32)
    img_out = img_base + 0.1 * jax.random.normal(k2, (2, 4, 16, 16),
                                                 dtype=jnp.float32)

    sam = sam_loss(img_base, img_out)
    jax.block_until_ready(sam)
    ref = _sam_ref(img_base, img_out)
    assert jnp.allclose(sam, ref, rtol=1e-4, atol=1e-4), (sam, ref)

    # Exercise the t == 0 / NaN-masking path with some zero-spectrum pixels.
    zb = img_base.at[:, :, :4, :4].set(0.0)
    zo = img_out.at[:, :, :4, :4].set(0.0)
    sam2 = sam_loss(zb, zo)
    jax.block_until_ready(sam2)
    ref2 = _sam_ref(zb, zo)
    assert jnp.allclose(sam2, ref2, rtol=1e-4, atol=1e-4), (sam2, ref2)

    # Exercise the 5-D input branch of the module.
    sam3 = sam_loss(img_base[:, None], img_out[:, None])
    jax.block_until_ready(sam3)
    assert jnp.allclose(sam3, ref, rtol=1e-4, atol=1e-4), (sam3, ref)

    print("KERNEL_OK")
</pallas_src>

<mosaic_0001>
module attributes {stable_mosaic.version = 11 : i64} {
  func.func @_sam_kernel(%arg0: i32, %arg1: i32, %arg2: memref<1x4x8x128xf32, #tpu.memory_space<vmem>>, %arg3: memref<1x4x8x128xf32, #tpu.memory_space<vmem>>, %arg4: memref<1x1x8x256xf32, #tpu.memory_space<vmem>>) attributes {dimension_semantics = [#tpu.dimension_semantics<parallel>, #tpu.dimension_semantics<parallel>], iteration_bounds = array<i64: 2, 1>, scalar_prefetch = 0 : i64, scratch_operands = 0 : i64, tpu.core_type = #tpu.core_type<tc>, window_params = [{transform_indices = @transform_0, window_bounds = array<i64: 1, 4, 8, 128>}, {transform_indices = @transform_1, window_bounds = array<i64: 1, 4, 8, 128>}, {transform_indices = @transform_2, window_bounds = array<i64: 1, 1, 8, 256>}]} {
    %cst = arith.constant 0.000000e+00 : f32
    %0 = vector.broadcast %cst : f32 to vector<8x128xf32>
    %cst_0 = arith.constant 0.000000e+00 : f32
    %1 = vector.broadcast %cst_0 : f32 to vector<8x128xf32>
    %cst_1 = arith.constant 0.000000e+00 : f32
    %2 = vector.broadcast %cst_1 : f32 to vector<8x128xf32>
    %c0 = arith.constant 0 : index
    %c0_2 = arith.constant 0 : index
    %c0_3 = arith.constant 0 : index
    %c0_4 = arith.constant 0 : index
    %3 = vector.load %arg2[%c0, %c0_2, %c0_3, %c0_4] : memref<1x4x8x128xf32, #tpu.memory_space<vmem>>, vector<1x1x8x128xf32>
    %4 = vector.shape_cast %3 : vector<1x1x8x128xf32> to vector<8x128xf32>
    %c0_5 = arith.constant 0 : index
    %c0_6 = arith.constant 0 : index
    %c0_7 = arith.constant 0 : index
    %c0_8 = arith.constant 0 : index
    %5 = vector.load %arg3[%c0_5, %c0_6, %c0_7, %c0_8] : memref<1x4x8x128xf32, #tpu.memory_space<vmem>>, vector<1x1x8x128xf32>
    %6 = vector.shape_cast %5 : vector<1x1x8x128xf32> to vector<8x128xf32>
    %7 = arith.mulf %4, %6 : vector<8x128xf32>
    %8 = arith.addf %0, %7 : vector<8x128xf32>
    %9 = arith.mulf %4, %4 : vector<8x128xf32>
    %10 = arith.addf %1, %9 : vector<8x128xf32>
    %11 = arith.mulf %6, %6 : vector<8x128xf32>
    %12 = arith.addf %2, %11 : vector<8x128xf32>
    %c0_9 = arith.constant 0 : index
    %c1 = arith.constant 1 : index
    %c0_10 = arith.constant 0 : index
    %c0_11 = arith.constant 0 : index
    %13 = vector.load %arg2[%c0_9, %c1, %c0_10, %c0_11] : memref<1x4x8x128xf32, #tpu.memory_space<vmem>>, vector<1x1x8x128xf32>
    %14 = vector.shape_cast %13 : vector<1x1x8x128xf32> to vector<8x128xf32>
    %c0_12 = arith.constant 0 : index
    %c1_13 = arith.constant 1 : index
    %c0_14 = arith.constant 0 : index
    %c0_15 = arith.constant 0 : index
    %15 = vector.load %arg3[%c0_12, %c1_13, %c0_14, %c0_15] : memref<1x4x8x128xf32, #tpu.memory_space<vmem>>, vector<1x1x8x128xf32>
    %16 = vector.shape_cast %15 : vector<1x1x8x128xf32> to vector<8x128xf32>
    %17 = arith.mulf %14, %16 : vector<8x128xf32>
    %18 = arith.addf %8, %17 : vector<8x128xf32>
    %19 = arith.mulf %14, %14 : vector<8x128xf32>
    %20 = arith.addf %10, %19 : vector<8x128xf32>
    %21 = arith.mulf %16, %16 : vector<8x128xf32>
    %22 = arith.addf %12, %21 : vector<8x128xf32>
    %c0_16 = arith.constant 0 : index
    %c2 = arith.constant 2 : index
    %c0_17 = arith.constant 0 : index
    %c0_18 = arith.constant 0 : index
    %23 = vector.load %arg2[%c0_16, %c2, %c0_17, %c0_18] : memref<1x4x8x128xf32, #tpu.memory_space<vmem>>, vector<1x1x8x128xf32>
    %24 = vector.shape_cast %23 : vector<1x1x8x128xf32> to vector<8x128xf32>
    %c0_19 = arith.constant 0 : index
    %c2_20 = arith.constant 2 : index
    %c0_21 = arith.constant 0 : index
    %c0_22 = arith.constant 0 : index
    %25 = vector.load %arg3[%c0_19, %c2_20, %c0_21, %c0_22] : memref<1x4x8x128xf32, #tpu.memory_space<vmem>>, vector<1x1x8x128xf32>
    %26 = vector.shape_cast %25 : vector<1x1x8x128xf32> to vector<8x128xf32>
    %27 = arith.mulf %24, %26 : vector<8x128xf32>
    %28 = arith.addf %18, %27 : vector<8x128xf32>
    %29 = arith.mulf %24, %24 : vector<8x128xf32>
    %30 = arith.addf %20, %29 : vector<8x128xf32>
    %31 = arith.mulf %26, %26 : vector<8x128xf32>
    %32 = arith.addf %22, %31 : vector<8x128xf32>
    %c0_23 = arith.constant 0 : index
    %c3 = arith.constant 3 : index
    %c0_24 = arith.constant 0 : index
    %c0_25 = arith.constant 0 : index
    %33 = vector.load %arg2[%c0_23, %c3, %c0_24, %c0_25] : memref<1x4x8x128xf32, #tpu.memory_space<vmem>>, vector<1x1x8x128xf32>
    %34 = vector.shape_cast %33 : vector<1x1x8x128xf32> to vector<8x128xf32>
    %c0_26 = arith.constant 0 : index
    %c3_27 = arith.constant 3 : index
    %c0_28 = arith.constant 0 : index
    %c0_29 = arith.constant 0 : index
    %35 = vector.load %arg3[%c0_26, %c3_27, %c0_28, %c0_29] : memref<1x4x8x128xf32, #tpu.memory_space<vmem>>, vector<1x1x8x128xf32>
    %36 = vector.shape_cast %35 : vector<1x1x8x128xf32> to vector<8x128xf32>
    %37 = arith.mulf %34, %36 : vector<8x128xf32>
    %38 = arith.addf %28, %37 : vector<8x128xf32>
    %39 = arith.mulf %34, %34 : vector<8x128xf32>
    %40 = arith.addf %30, %39 : vector<8x128xf32>
    %41 = arith.mulf %36, %36 : vector<8x128xf32>
    %42 = arith.addf %32, %41 : vector<8x128xf32>
    %43 = arith.mulf %40, %42 : vector<8x128xf32>
    %44 = math.sqrt %43 : vector<8x128xf32>
    %cst_30 = arith.constant 0.000000e+00 : f32
    %45 = vector.broadcast %cst_30 : f32 to vector<8x128xf32>
    %46 = arith.cmpf ogt, %44, %45 : vector<8x128xf32>
    %47 = arith.extui %46 : vector<8x128xi1> to vector<8x128xi32>
    %48 = arith.sitofp %47 : vector<8x128xi32> to vector<8x128xf32>
    %49 = arith.divf %38, %44 : vector<8x128xf32>
    %cst_31 = arith.constant 5.000000e-01 : f32
    %50 = vector.broadcast %cst_31 : f32 to vector<8x128xf32>
    %51 = arith.cmpf ogt, %49, %50 : vector<8x128xf32>
    %cst_32 = arith.constant -5.000000e-01 : f32
    %52 = vector.broadcast %cst_32 : f32 to vector<8x128xf32>
    %53 = arith.cmpf olt, %49, %52 : vector<8x128xf32>
    %cst_33 = arith.constant 1.000000e+00 : f32
    %54 = vector.broadcast %cst_33 : f32 to vector<8x128xf32>
    %55 = arith.subf %54, %49 : vector<8x128xf32>
    %cst_34 = arith.constant 5.000000e-01 : f32
    %56 = vector.broadcast %cst_34 : f32 to vector<8x128xf32>
    %57 = arith.mulf %56, %55 : vector<8x128xf32>
    %58 = math.sqrt %57 : vector<8x128xf32>
    %cst_35 = arith.constant 1.000000e+00 : f32
    %59 = vector.broadcast %cst_35 : f32 to vector<8x128xf32>
    %60 = arith.addf %59, %49 : vector<8x128xf32>
    %cst_36 = arith.constant 5.000000e-01 : f32
    %61 = vector.broadcast %cst_36 : f32 to vector<8x128xf32>
    %62 = arith.mulf %61, %60 : vector<8x128xf32>
    %63 = math.sqrt %62 : vector<8x128xf32>
    %64 = arith.select %53, %63, %49 : vector<8x128xi1>, vector<8x128xf32>
    %65 = arith.select %51, %58, %64 : vector<8x128xi1>, vector<8x128xf32>
    %66 = arith.mulf %65, %65 : vector<8x128xf32>
    %cst_37 = arith.constant 4.216320e-02 : f32
    %67 = vector.broadcast %cst_37 : f32 to vector<8x128xf32>
    %68 = arith.mulf %67, %66 : vector<8x128xf32>
    %cst_38 = arith.constant 0.024181312 : f32
    %69 = vector.broadcast %cst_38 : f32 to vector<8x128xf32>
    %70 = arith.addf %68, %69 : vector<8x128xf32>
    %71 = arith.mulf %70, %66 : vector<8x128xf32>
    %cst_39 = arith.constant 0.0454700254 : f32
    %72 = vector.broadcast %cst_39 : f32 to vector<8x128xf32>
    %73 = arith.addf %71, %72 : vector<8x128xf32>
    %74 = arith.mulf %73, %66 : vector<8x128xf32>
    %cst_40 = arith.constant 0.0749530047 : f32
    %75 = vector.broadcast %cst_40 : f32 to vector<8x128xf32>
    %76 = arith.addf %74, %75 : vector<8x128xf32>
    %77 = arith.mulf %76, %66 : vector<8x128xf32>
    %cst_41 = arith.constant 0.166667521 : f32
    %78 = vector.broadcast %cst_41 : f32 to vector<8x128xf32>
    %79 = arith.addf %77, %78 : vector<8x128xf32>
    %80 = arith.mulf %65, %66 : vector<8x128xf32>
    %81 = arith.mulf %80, %79 : vector<8x128xf32>
    %82 = arith.addf %65, %81 : vector<8x128xf32>
    %cst_42 = arith.constant 2.000000e+00 : f32
    %83 = vector.broadcast %cst_42 : f32 to vector<8x128xf32>
    %84 = arith.mulf %83, %82 : vector<8x128xf32>
    %cst_43 = arith.constant 2.000000e+00 : f32
    %85 = vector.broadcast %cst_43 : f32 to vector<8x128xf32>
    %86 = arith.mulf %85, %82 : vector<8x128xf32>
    %cst_44 = arith.constant 3.14159274 : f32
    %87 = vector.broadcast %cst_44 : f32 to vector<8x128xf32>
    %88 = arith.subf %87, %86 : vector<8x128xf32>
    %cst_45 = arith.constant 1.57079637 : f32
    %89 = vector.broadcast %cst_45 : f32 to vector<8x128xf32>
    %90 = arith.subf %89, %82 : vector<8x128xf32>
    %91 = arith.select %53, %88, %90 : vector<8x128xi1>, vector<8x128xf32>
    %92 = arith.select %51, %84, %91 : vector<8x128xi1>, vector<8x128xf32>
    %93 = arith.cmpf one, %92, %92 : vector<8x128xf32>
    %cst_46 = arith.constant 0.000000e+00 : f32
    %94 = vector.broadcast %cst_46 : f32 to vector<8x128xf32>
    %95 = arith.select %93, %94, %92 : vector<8x128xi1>, vector<8x128xf32>
    %96 = vector.shape_cast %95 : vector<8x128xf32> to vector<1x8x128xf32>
    %cst_47 = arith.constant dense<0.000000e+00> : vector<8x128xf32>
    %97 = vector.multi_reduction <add>, %96, %cst_47 [0] : vector<1x8x128xf32> to vector<8x128xf32>
    %98 = vector.shape_cast %48 : vector<8x128xf32> to vector<1x8x128xf32>
    %cst_48 = arith.constant dense<0.000000e+00> : vector<8x128xf32>
    %99 = vector.multi_reduction <add>, %98, %cst_48 [0] : vector<1x8x128xf32> to vector<8x128xf32>
    %100 = tpu.concatenate %97, %99 in 1 : vector<8x128xf32>, vector<8x128xf32> -> vector<8x256xf32>
    %c0_49 = arith.constant 0 : index
    %c0_50 = arith.constant 0 : index
    %c0_51 = arith.constant 0 : index
    %c0_52 = arith.constant 0 : index
    %101 = vector.load %arg4[%c0_49, %c0_50, %c0_51, %c0_52] : memref<1x1x8x256xf32, #tpu.memory_space<vmem>>, vector<1x1x8x256xf32>
    %102 = vector.shape_cast %101 : vector<1x1x8x256xf32> to vector<8x256xf32>
    %103 = vector.shape_cast %100 : vector<8x256xf32> to vector<1x1x8x256xf32>
    tpu.vector_store %arg4[%c0_49, %c0_50, %c0_51, %c0_52], %103 {strides = array<i32>} : memref<1x1x8x256xf32, #tpu.memory_space<vmem>>, vector<1x1x8x256xf32>,
    return
  }
  func.func @transform_0(%arg0: i32, %arg1: i32) -> (i32, i32, i32, i32) {
    %c0_i32 = arith.constant 0 : i32
    %c0_i32_0 = arith.constant 0 : i32
    %c0_i32_1 = arith.constant 0 : i32
    return %arg0, %c0_i32, %arg1, %c0_i32_0 : i32, i32, i32, i32
  }
  func.func @transform_1(%arg0: i32, %arg1: i32) -> (i32, i32, i32, i32) {
    %c0_i32 = arith.constant 0 : i32
    %c0_i32_0 = arith.constant 0 : i32
    %c0_i32_1 = arith.constant 0 : i32
    return %arg0, %c0_i32, %arg1, %c0_i32_0 : i32, i32, i32, i32
  }
  func.func @transform_2(%arg0: i32, %arg1: i32) -> (i32, i32, i32, i32) {
    %c0_i32 = arith.constant 0 : i32
    %c0_i32_0 = arith.constant 0 : i32
    %c0_i32_1 = arith.constant 0 : i32
    return %arg0, %arg1, %c0_i32, %c0_i32_0 : i32, i32, i32, i32
  }
}

</mosaic_0001>

<bundles_post_ra>
// kernel: tpu_custom_call.1
= control target key start
LH: loop header
LB: loop body
LE: loop exit
PB: predicated region body
PF: predicated region fallthrough
CT: control target
= control target key end

     0   :  { %7 = vsyncpa [#allocation3], 0  ;;  %s963_s0 = inlined_call_operand.hbm [shape: f32[2,4,8,128], index: 0, kind: input, shape index: {}]   ;;  %s964_s1 = inlined_call_operand.hbm [shape: f32[2,4,8,128], index: 1, kind: input, shape index: {}]   ;;  %s965_s2 = inlined_call_operand.hbm [shape: f32[2,1,8,256], index: 2, kind: output, shape index: {}]  }
   0x1   :  { %9 = vsyncpa [#allocation3 + $0x1], 0 }
   0x2   :  { %10 = vsyncpa [#allocation6], 0 }
   0x3   :  { %12 = vsyncpa [#allocation6 + $0x1], 0 }
   0x4   :  { %13 = vsyncpa [#allocation4], 0 }
   0x5   :  { %15 = vsyncpa [#allocation4 + $0x1], 0  ;;  %s719_s9 = smov 0   ;;  %s721_s10 = smov 0  }
   0x6   :  { %s723_s11 = smov 0   ;;  %s725_s12 = smov 0  }
   0x7   :  { %s727_s13 = smov 0   ;;  %s729_s14 = smov 0  }
   0x8 LB: > { %s443_s15 = sadd.s32 4294967295, %s696_s14   ;;  %s444_s16 = sadd.s32 4294967294, %s696_s14   ;;  %s696_s14 = sphi %s729_s14, %s21_s14   ;;  %s692_s13 = sphi %s727_s13, %s983_s13   ;;  %s688_s12 = sphi %s725_s12, %s982_s12   ;;  %s684_s11 = sphi %s723_s11, %s981_s11   ;;  %s680_s10 = sphi %s721_s10, %s980_s10   ;;  %s676_s9 = sphi %s719_s9, %s979_s9  }
   0x9   : > { %s33_s17 = sadd.s32 1, %s692_s13  ;;  %s42_s18 = sadd.s32 1, %s684_s11 }
   0xa   : > { %p35_p0 = scmp.ge.s32.totalorder %s33_s17, 2  ;;  %p49_p1 = scmp.ne.s32.totalorder %s684_s11, %s680_s10 }
   0xb   : > { %p50_p2 = scmp.eq.s32.totalorder %s696_s14, 0  ;;  %p55_p3 = scmp.ne.s32.totalorder %s680_s10, %s676_s9 }
   0xc   : > { %s985_s17 = smov (%p35_p0, %s33_s17), 0  ;;  %p56_p5 = scmp.eq.s32.totalorder %s443_s15, 0 }
   0xd   : > { %p760_p4 = por %p50_p2, %p49_p1  ;;  %s37_s20 = ssub.s32 %s692_s13, %s985_s17 }
   0xe   : > { %p109_p6 = scmp.eq.s32.totalorder %s443_s15, 1  ;;  %p40_p7 = scmp.eq.s32.totalorder %s37_s20, 0 }
   0xf   : > { %p766_p8 = por %p56_p5, %p55_p3  ;;  %p115_p10 = scmp.eq.s32.totalorder %s444_s16, 1 }
  0x10   : > { %p770_p9 = por %p109_p6, %p49_p1  ;;  %p489_p13 = scmp.lt.s32.totalorder %s696_s14, 2 }
  0x11   : > { %s969_s21 = scalar_select %p766_p8, 1, 0 }
  0x12   : > { %s970_s22 = scalar_select %p770_p9, 1, 0 }
  0x13   : > { %s775_s23 = scalar_select %p40_p7, %s684_s11, %s42_s18  }
  0x14   : > { %p777_p11 = por %p115_p10, %p55_p3  ;;  %s784_s25 = sand.u32 1, %s684_s11  }
  0x15   : > { %s447_s26 = sshll.u32 %s784_s25, 5  ;;  %s469_s27 = sshll.u32 %s692_s13, 9 }
  0x16   : > { %s971_s24 = scalar_select %p777_p11, 1, 0 }
  0x17   : > { %s793_s30 = scalar_lea.hbm %s963_s0, %s469_s27  ;;  %s139_s3 = scalar_lea.vmem [#allocation2], %s447_s26 }
  0x18   : > { %s147_s4 = sshll.u32 %s139_s3, 4  ;;  %p801_p0 = pnand %p489_p13, %p760_p4  ;;  %s797_s4 = int_to_ptr.vmem [resolvable:$true] %s147_s4 }
  0x19   : > { %s136_s6 = scalar_lea.sflag [#allocation3], %s784_s25  ;;  %s550_s7 = scalar_lea.hbm %s793_s30, 512 }
  0x1a   : > { %p551_p2 = scmp.ne.s32.totalorder %s793_s30, %s550_s7  ;;  %p552_p3 = pneg %p801_p0 }
  0x1b   : > { %s555_s16 = scalar_lea.hbm %s963_s0, 1024  ;;  %p556_p4 = scmp.lt.u32.totalorder %s793_s30, %s963_s0 }
  0x1c   : > { %p553_p5 = pnand %p552_p3, %p551_p2  ;;  %p557_p7 = scmp.lt.u32.totalorder %s555_s16, %s550_s7 }
  0x1d   : > { %p559_p13 = scmp.lt.u32.totalorder %s550_s7, %s793_s30 }
  0x1e   : > { %p554_p6 = pneg %p553_p5  ;;  %p558_p10 = por %p557_p7, %p556_p4 }
  0x20   : > { %p560_p12 = por %p559_p13, %p558_p10 }
  0x22   : > { %p561_p1 = pnand %p560_p12, %p554_p6 }
  0x24   : > { %564 = shalt.err (!%p561_p1)
}
  0x25   : > { %s565_s20 = scalar_lea.vmem %s797_s4, 512  ;;  %s698_s28 = smov [#allocation2]  }
  0x26   : > { %p566_p2 = scmp.ne.s32.totalorder %s797_s4, %s565_s20  ;;  %s570_s29 = sshll.u32 %s698_s28, 4  ;;  %s571_s29 = int_to_ptr.vmem [resolvable:$false] %s570_s29 }
  0x27   : > { %s572_s3 = scalar_lea.vmem %s571_s29, 1024  ;;  %p573_p9 = scmp.lt.s32.totalorder %s797_s4, %s571_s29 }
  0x28   : > { %p568_p5 = pnand %p566_p2, %p552_p3  ;;  %p574_p4 = scmp.lt.s32.totalorder %s572_s3, %s565_s20 }
  0x2a   : > { %p569_p11 = pneg %p568_p5  ;;  %p575_p7 = por %p574_p4, %p573_p9 }
  0x2c   : > { %p576_p10 = pnand %p575_p7, %p569_p11 }
  0x2e   : > { %579 = shalt.err (!%p576_p10)
}
  0x2f   : > { %s699_s7 = smov 128   ;;  %s700_s8 = smov 8  }
  0x30   : > { %481 = dma.hbm_to_vmem [thread:$0]  (!%p801_p0), %s793_s30, 512, %s797_s4, %s136_s6, %s699_s7, %s699_s7, %s700_s8  }
  0x31   : > { %p177_p9 = scmp.lt.s32.totalorder %s696_s14, 3  ;;  %s843_s18 = scalar_lea.hbm %s964_s1, %s469_s27 }
  0x32   : > { %p973_p11 = scmp.ge.s32.totalorder %s696_s14, 1  ;;  %s161_s20 = scalar_lea.vmem [#allocation5], %s447_s26 }
  0x33   : > { %s169_s28 = sshll.u32 %s161_s20, 4  ;;  %s158_s30 = scalar_lea.sflag [#allocation6], %s784_s25  ;;  %s853_s28 = int_to_ptr.vmem [resolvable:$true] %s169_s28 }
  0x34   : > { %p847_p12 = pnand %p973_p11, %p177_p9  ;;  %s580_s4 = scalar_lea.hbm %s843_s18, 512 }
  0x35   : > { %p581_p1 = scmp.ne.s32.totalorder %s843_s18, %s580_s4  ;;  %s585_s29 = scalar_lea.hbm %s964_s1, 1024 }
  0x36   : > { %p586_p2 = scmp.lt.u32.totalorder %s843_s18, %s964_s1  ;;  %p587_p5 = scmp.lt.u32.totalorder %s585_s29, %s580_s4 }
  0x37   : > { %p583_p6 = pnand %p581_p1, %p552_p3  ;;  %p589_p7 = scmp.lt.u32.totalorder %s580_s4, %s843_s18 }
  0x38   : > { %p588_p4 = por %p587_p5, %p586_p2 }
  0x39   : > { %p584_p13 = pneg %p583_p6 }
  0x3a   : > { %p590_p10 = por %p589_p7, %p588_p4 }
  0x3c   : > { %p591_p9 = pnand %p590_p10, %p584_p13 }
  0x3e   : > { %594 = shalt.err (!%p591_p9)
}
  0x3f   : > { %s595_s26 = scalar_lea.vmem %s853_s28, 512  ;;  %s701_s16 = smov [#allocation5]  }
  0x40   : > { %p596_p11 = scmp.ne.s32.totalorder %s853_s28, %s595_s26  ;;  %s600_s20 = sshll.u32 %s701_s16, 4  ;;  %s601_s20 = int_to_ptr.vmem [resolvable:$false] %s600_s20 }
  0x41   : > { %s602_s27 = scalar_lea.vmem %s601_s20, 1024  ;;  %p603_p8 = scmp.lt.s32.totalorder %s853_s28, %s601_s20 }
  0x42   : > { %p598_p1 = pnand %p596_p11, %p552_p3  ;;  %p604_p2 = scmp.lt.s32.totalorder %s602_s27, %s595_s26 }
  0x44   : > { %p599_p6 = pneg %p598_p1  ;;  %p605_p5 = por %p604_p2, %p603_p8 }
  0x46   : > { %p606_p4 = pnand %p605_p5, %p599_p6 }
  0x48   : > { %609 = shalt.err (!%p606_p4)
}
  0x49   : > { %484 = dma.hbm_to_vmem [thread:$0]  (!%p801_p0), %s843_s18, 512, %s853_s28, %s158_s30, %s699_s7, %s699_s7, %s700_s8  }
  0x4a   : > { %181 = sbr.rel (%p847_p12) target bundleno = 190 (0xbe), region = 28  ;;  %s887_s4 = sand.u32 (!%p847_p12), 1, %s680_s10  }
  0x4b   : > { %s454_s6 = sshll.u32 (!%p847_p12), %s887_s4, 5  ;;  %s184_s29 = scalar_lea.sflag (!%p847_p12), [#allocation3], %s887_s4 }
  0x4c   : > { %s187_s5 = scalar_lea.vmem (!%p847_p12), [#allocation2], %s454_s6  ;;  %p975_p8 = scmp.ne.s32.totalorder (!%p847_p12), %s969_s21, 0 }
  0x51   : > { %663 = dma.done.wait (%p975_p8), %s184_s29, 512  }
  0x52   : > { %665 = vsyncadd (%p975_p8), %s184_s29, 4294966784  ;;  %s193_s25 = scalar_lea.sflag [#allocation6], %s887_s4  ;;  %s196_s7 = scalar_lea.vmem [#allocation5], %s454_s6 }
  0x53   : > { %667 = dma.done.wait (%p975_p8), %s193_s25, 512  }
  0x54   : > { %669 = vsyncadd (%p975_p8), %s193_s25, 4294966784  ;;  %v222_v0 = vld [vmem:[%s187_s5] sm:$0xff]  ;;  %v457_v2 = vld [vmem:[%s187_s5 + $0x8] sm:$0xff]  ;;  %s456_s21 = sshll.u32 %s887_s4, 4  ;;  %v702_v32 = vmov 0.0   ;;  %s471_s19 = sshll.u32 %s688_s12, 8 }
  0x55   : > { %v223_v1 = vld [vmem:[%s196_s7] sm:$0xff]  ;;  %v226_v3 = vmul.f32 %v222_v0, %v222_v0  ;;  %v458_v5 = vld [vmem:[%s196_s7 + $0x8] sm:$0xff]  ;;  %v236_v6 = vmul.f32 %v457_v2, %v457_v2  ;;  %v459_v7 = vld [vmem:[%s187_s5 + $0x10] sm:$0xff]  ;;  %s901_s8 = scalar_lea.vmem [#allocation7], %s456_s21  ;;  %s915_s3 = scalar_lea.hbm %s965_s2, %s471_s19 }
  0x56   : > { %v228_v4 = vmul.f32 %v223_v1, %v223_v1  ;;  %v460_v8 = vld [vmem:[%s196_s7 + $0x10] sm:$0xff]  ;;  %v238_v9 = vmul.f32 %v458_v5, %v458_v5  ;;  %v246_v10 = vmul.f32 %v459_v7, %v459_v7  ;;  %v461_v11 = vld [vmem:[%s187_s5 + $0x18] sm:$0xff]  ;;  %v224_v24 = vmul.f32 %v223_v1, %v222_v0  ;;  %s335_s18 = sshll.u32 %s901_s8, 4  ;;  %s319_s15 = scalar_lea.sflag [#allocation4], %s887_s4  ;;  %s910_s18 = int_to_ptr.vmem [resolvable:$true] %s335_s18 }
  0x57   : > { %v462_v12 = vld [vmem:[%s196_s7 + $0x18] sm:$0xff]  ;;  %v237_v13 = vadd.f32 %v236_v6, %v226_v3  ;;  %v248_v14 = vmul.f32 %v460_v8, %v460_v8  ;;  %v256_v15 = vmul.f32 %v461_v11, %v461_v11  ;;  %v234_v25 = vmul.f32 %v458_v5, %v457_v2  ;;  %s610_s26 = scalar_lea.vmem %s910_s18, 256  ;;  %p976_p3 = scmp.ne.s32.totalorder %s970_s22, 0 }
  0x58   : > { %v239_v16 = vadd.f32 %v238_v9, %v228_v4  ;;  %v258_v17 = vmul.f32 %v462_v12, %v462_v12  ;;  %v244_v30 = vmul.f32 %v460_v8, %v459_v7  ;;  %v254_v35 = vmul.f32 %v462_v12, %v461_v11  ;;  %p611_p0 = scmp.ne.s32.totalorder %s910_s18, %s610_s26  ;;  %s703_s12 = smov [#allocation7]  }
  0x59   : > { %v247_v18 = vadd.f32 %v246_v10, %v237_v13  ;;  %v235_v29 = vadd.f32 %v234_v25, %v224_v24  ;;  %s614_s16 = sshll.u32 %s703_s12, 4  ;;  %s615_s16 = int_to_ptr.vmem [resolvable:$false] %s614_s16 }
  0x5a   : > { %v249_v19 = vadd.f32 %v248_v14, %v239_v16  ;;  %p612_p12 = pnand %p611_p0, %p976_p3  ;;  %s616_s20 = scalar_lea.vmem %s615_s16, 512 }
  0x5b   : > { %v257_v20 = vadd.f32 %v256_v15, %v247_v18  ;;  %v245_v34 = vadd.f32 %v244_v30, %v235_v29  ;;  %p617_p7 = scmp.lt.s32.totalorder %s910_s18, %s615_s16  ;;  %p618_p10 = scmp.lt.s32.totalorder %s616_s20, %s610_s26 }
  0x5c   : > { %v259_v21 = vadd.f32 %v258_v17, %v249_v19  ;;  %p613_p13 = pneg %p612_p12 }
  0x5d   : > { %v255_v36 = vadd.f32 %v254_v35, %v245_v34  ;;  %p619_p9 = por %p618_p10, %p617_p7 }
  0x5e   : > { %v260_v22 = vmul.f32 %v259_v21, %v257_v20 }
  0x5f   : > { %p620_p11 = pnand %p619_p9, %p613_p13 }
  0x60   : > { %542 = vrsqrt.f32 %v260_v22  ;;  %vm263_vm0 = vcmp.eq.f32.partialorder %v260_v22, inf  ;;  %v266_v26 = vand.u32 2147483648, %v260_v22  ;;  %vm265_vm1 = vcmp.eq.f32.partialorder %v260_v22, 0.0 }
  0x6a   : > { %v543_v23 = vpop.eup %542 }
  0x6b   : > { %v262_v27 = vmul.f32 %v543_v23, %v260_v22 }
  0x6d   : > { %v264_v28 = vsel %vm263_vm0, %v260_v22, %v262_v27 }
  0x6e   : > { %v267_v31 = vsel %vm265_vm1, %v266_v26, %v264_v28 }
  0x6f   : > { %544 = vrcp.f32 %v267_v31  ;;  %vm268_vm2 = vcmp.gt.f32.partialorder %v267_v31, 0.0 }
  0x70   : > { %v463_v33 = vsel %vm268_vm2, 1.0, %v702_v32 }
  0x71   : > { %317 = vst [vmem:[%s901_s8 + $0x8] sm:$0xff] %v463_v33 }
  0x79   : > { %v545_v37 = vpop.eup %544 }
  0x7a   : > { %v272_v38 = vmul.f32 %v545_v37, %v255_v36 }
  0x7c   : > { %v275_v39 = vsub.f32 1.0, %v272_v38  ;;  %v284_v40 = vadd.f32 1.0, %v272_v38  ;;  %vm274_vm7 = vcmp.lt.f32.partialorder %v272_v38, -0.5  ;;  %vm273_vm8 = vcmp.gt.f32.partialorder %v272_v38, 0.5 }
  0x7e   : > { %v276_v41 = vmul.f32 0.5, %v275_v39  ;;  %v285_v42 = vmul.f32 0.5, %v284_v40 }
  0x80   : > { %546 = vrsqrt.f32 %v276_v41  ;;  %vm279_vm3 = vcmp.eq.f32.partialorder %v276_v41, inf  ;;  %v282_v44 = vand.u32 2147483648, %v276_v41  ;;  %vm281_vm4 = vcmp.eq.f32.partialorder %v276_v41, 0.0 }
  0x81   : > { %548 = vrsqrt.f32 %v285_v42  ;;  %vm288_vm5 = vcmp.eq.f32.partialorder %v285_v42, inf  ;;  %v291_v47 = vand.u32 2147483648, %v285_v42  ;;  %vm290_vm6 = vcmp.eq.f32.partialorder %v285_v42, 0.0 }
  0x8a   : > { %v547_v43 = vpop.eup %546 }
  0x8b   : > { %v549_v45 = vpop.eup %548  ;;  %v278_v46 = vmul.f32 %v547_v43, %v276_v41 }
  0x8c   : > { %v287_v48 = vmul.f32 %v549_v45, %v285_v42 }
  0x8d   : > { %v280_v49 = vsel %vm279_vm3, %v276_v41, %v278_v46 }
  0x8e   : > { %v283_v50 = vsel %vm281_vm4, %v282_v44, %v280_v49  ;;  %v289_v51 = vsel %vm288_vm5, %v285_v42, %v287_v48 }
  0x8f   : > { %v292_v52 = vsel %vm290_vm6, %v291_v47, %v289_v51 }
  0x90   : > { %v293_v53 = vsel %vm274_vm7, %v292_v52, %v272_v38 }
  0x91   : > { %v294_v54 = vsel %vm273_vm8, %v283_v50, %v293_v53 }
  0x92   : > { %v295_v55 = vmul.f32 %v294_v54, %v294_v54 }
  0x94   : > { %v296_v56 = vmul.f32 0.0421632, %v295_v55  ;;  %v304_v63 = vmul.f32 %v295_v55, %v294_v54 }
  0x96   : > { %v297_v57 = vadd.f32 0.024181312, %v296_v56 }
  0x98   : > { %v298_v58 = vmul.f32 %v297_v57, %v295_v55 }
  0x9a   : > { %v299_v59 = vadd.f32 0.045470025, %v298_v58 }
  0x9c   : > { %v300_v60 = vmul.f32 %v299_v59, %v295_v55 }
  0x9e   : > { %v301_v61 = vadd.f32 0.074953005, %v300_v60 }
  0xa0   : > { %v302_v62 = vmul.f32 %v301_v61, %v295_v55 }
  0xa2   : > { %v303_v0 = vadd.f32 0.16666752, %v302_v62 }
  0xa4   : > { %v305_v1 = vmul.f32 %v304_v63, %v303_v0 }
  0xa6   : > { %v306_v2 = vadd.f32 %v305_v1, %v294_v54 }
  0xa8   : > { %v307_v3 = vmul.f32 2.0, %v306_v2  ;;  %v309_v4 = vsub.f32 1.5707964, %v306_v2 }
  0xaa   : > { %v308_v5 = vsub.f32 3.1415927, %v307_v3 }
  0xac   : > { %v310_v6 = vsel %vm274_vm7, %v308_v5, %v309_v4 }
  0xad   : > { %v311_v7 = vsel %vm273_vm8, %v307_v3, %v310_v6 }
  0xae   : > { %vm312_vm9 = vcmp.ne.f32.partialorder %v311_v7, %v311_v7 }
  0xaf   : > { %v313_v8 = vsel %vm312_vm9, 0.0, %v311_v7 }
  0xb0   : > { %316 = vst [vmem:[%s901_s8] sm:$0xff] %v313_v8 }
  0xb1   : > { %623 = shalt.err (!%p620_p11)
}
  0xb2   : > { %s624_s27 = scalar_lea.hbm %s915_s3, 256  ;;  %s628_s29 = scalar_lea.hbm %s965_s2, 512 }
  0xb3   : > { %p625_p1 = scmp.ne.s32.totalorder %s915_s3, %s624_s27  ;;  %p629_p5 = scmp.lt.u32.totalorder %s915_s3, %s965_s2 }
  0xb4   : > { %p630_p4 = scmp.lt.u32.totalorder %s628_s29, %s624_s27  ;;  %p632_p0 = scmp.lt.u32.totalorder %s624_s27, %s915_s3 }
  0xb5   : > { %p626_p6 = pnand %p625_p1, %p976_p3 }
  0xb6   : > { %p631_p8 = por %p630_p4, %p629_p5 }
  0xb7   : > { %p627_p2 = pneg %p626_p6 }
  0xb8   : > { %p633_p12 = por %p632_p0, %p631_p8 }
  0xba   : > { %p634_p13 = pnand %p633_p12, %p627_p2 }
  0xbc   : > { %637 = shalt.err (!%p634_p13)
}
  0xbd   : > { %476 = dma.vmem_to_hbm [thread:$0]  (%p976_p3), %s910_s18, 256, %s915_s3, %s319_s15  }
  0xbe PF: > { %s347_s7 = sand.u32 1, %s676_s9   ;;  %p977_p7 = scmp.ne.s32.totalorder %s971_s24, 0 }
  0xbf   : > { %p978_p10 = scmp.ge.s32.totalorder %s696_s14, 2  ;;  %s348_s21 = scalar_lea.sflag [#allocation4], %s347_s7 }
  0xc1   : > { %p486_p9 = pnand %p978_p10, %p977_p7 }
  0xc3   : > { %671 = dma.done.wait (!%p486_p9), %s348_s21, 256  }
  0xc4   : > { %673 = vsyncadd (!%p486_p9), %s348_s21, 4294967040  ;;  %s21_s14 = sadd.s32 1, %s696_s14   ;;  %s979_s9 = smov %s680_s10 }
  0xc5   : > { %p18_p11 = scmp.ge.s32.totalorder %s21_s14, 4   ;;  %s980_s10 = smov %s684_s11 }
  0xc6   : > { %s981_s11 = smov %s775_s23  ;;  %s982_s12 = smov %s692_s13 }
  0xc7   : > { %s983_s13 = smov %s985_s17  ;;  %20 = sbr.rel (!%p18_p11) target bundleno = 8 (0x8), region = 92 }
  0xce   :  { %353 = vsyncpa [#allocation3], 1 }
  0xcf   :  { %355 = vsyncpa [#allocation3 + $0x1], 1 }
  0xd0   :  { %356 = vsyncpa [#allocation6], 1 }
  0xd1   :  { %358 = vsyncpa [#allocation6 + $0x1], 1 }
  0xd2   :  { %359 = vsyncpa [#allocation4], 1 }
  0xd3   :  { %361 = vsyncpa [#allocation4 + $0x1], 1 }

</bundles_post_ra>
